<compile_context>
chip_gen: v7x
topology: tpu7x:2x2x1
jax: 0.10.0
libtpu: 0.0.40
codegen_flags: <defaults>
</compile_context>

<pallas_src>
import jax
import jax.numpy as jnp
from jax.experimental import pallas as pl
from jax.experimental.pallas import tpu as pltpu

D_IN = 784
D_OUT = 10
TB_MAX = 2048  # batch-tile rows; bf16-streamed footprint ~10 MiB double-buffered


def _round_up(n, m):
    return ((n + m - 1) // m) * m


def _choose_tile(B, tb_max):
    """Even, balanced tile count (>=2 tiles when B is large), rows multiple of 8."""
    if B <= 8:
        return B  # single full-extent block; (B, 784) == full array dims is legal
    n_tiles = 2 * pl.cdiv(B, 2 * tb_max)          # even -> balanced across v7x's 2 TCs
    tb = _round_up(pl.cdiv(B, n_tiles), 8)
    return min(tb, _round_up(tb_max, 8))


def linear_kernel(x_ref, w_ref, b_ref, o_ref):
    # x_ref: (TB, 784) stream_dtype — current batch tile (streamed, double-buffered)
    # w_ref: (784, 10) stream_dtype — full weight in natural (K, N) layout, resident
    # b_ref: (1, 10)   f32          — bias, resident
    # o_ref: (TB, 10)  f32
    acc = jnp.dot(x_ref[...], w_ref[...], preferred_element_type=jnp.float32)
    # NOTE: output lane width 10 (<128) -> masked stores, but writeback is ~1% of
    # traffic; keep the narrow layout (pad-to-128 only on a measured win).
    o_ref[...] = acc + b_ref[...]


def minist_logistic_forward(x, weight, bias, *, stream_dtype=jnp.bfloat16,
                            tb_max=TB_MAX):
    """x: (B, 784) f32, weight: (10, 784) f32, bias: (10,) f32 -> (B, 10) f32."""
    B, D = x.shape
    O = weight.shape[0]
    assert D == D_IN and O == D_OUT and weight.shape == (O, D)

    xs = x.astype(stream_dtype)                 # stream x in reduced precision
    wT = weight.T.astype(stream_dtype)          # one-time wrapper transpose -> (K, N)
    b2 = bias.reshape(1, O).astype(jnp.float32)

    tb = _choose_tile(B, tb_max)
    grid = (pl.cdiv(B, tb),)
    item = jnp.dtype(stream_dtype).itemsize

    cost = pl.CostEstimate(
        flops=2 * B * D * O,
        transcendentals=0,
        bytes_accessed=(B * D + D * O) * item + (O + B * O) * 4,
    )

    return pl.pallas_call(
        linear_kernel,
        out_shape=jax.ShapeDtypeStruct((B, O), jnp.float32),
        grid=grid,
        in_specs=[
            pl.BlockSpec((tb, D), lambda i: (i, 0)),   # x: stream batch tiles
            pl.BlockSpec((D, O), lambda i: (0, 0)),    # weight: VMEM-resident
            pl.BlockSpec((1, O), lambda i: (0, 0)),    # bias: VMEM-resident
        ],
        out_specs=pl.BlockSpec((tb, O), lambda i: (i, 0)),
        compiler_params=pltpu.CompilerParams(
            dimension_semantics=("parallel",),          # batch tiles are independent
            vmem_limit_bytes=32 * 1024 * 1024,          # explicit scope (v5e default is 16 MiB)
        ),
        cost_estimate=cost,
    )(xs, wT, b2)


if __name__ == "__main__":
    key = jax.random.PRNGKey(0)
    kx, kw, kb, kx2 = jax.random.split(key, 4)

    D, O = D_IN, D_OUT
    # Deterministic init mirroring nn.Linear defaults: U(-1/sqrt(D), 1/sqrt(D))
    bound = 1.0 / (D ** 0.5)
    weight = jax.random.uniform(kw, (O, D), minval=-bound, maxval=bound, dtype=jnp.float32)
    bias = jax.random.uniform(kb, (O,), minval=-bound, maxval=bound, dtype=jnp.float32)

    def ref_f32(x):
        return x @ weight.T + bias

    def ref_bf16(x):
        return jnp.dot(x.astype(jnp.bfloat16), weight.T.astype(jnp.bfloat16),
                       preferred_element_type=jnp.float32) + bias

    # Case 1: small batch, single tile, default bf16 streaming.
    x1 = jax.random.normal(kx, (8, D), dtype=jnp.float32)
    out1 = jax.block_until_ready(minist_logistic_forward(x1, weight, bias))
    assert out1.shape == (8, O) and out1.dtype == jnp.float32
    assert jnp.allclose(out1, ref_bf16(x1), atol=1e-3, rtol=1e-3)
    assert jnp.allclose(out1, ref_f32(x1), atol=3e-2, rtol=3e-2)

    # Case 2: multi-tile pipelined path with a partial last tile (B % tb != 0).
    x2 = jax.random.normal(kx2, (300, D), dtype=jnp.float32)
    out2 = jax.block_until_ready(minist_logistic_forward(x2, weight, bias, tb_max=128))
    assert out2.shape == (300, O)
    assert jnp.allclose(out2, ref_bf16(x2), atol=1e-3, rtol=1e-3)
    assert jnp.allclose(out2, ref_f32(x2), atol=3e-2, rtol=3e-2)

    # Case 3: exact f32 streaming path preserves the module's f32 numerics.
    out3 = jax.block_until_ready(
        minist_logistic_forward(x1, weight, bias, stream_dtype=jnp.float32))
    assert jnp.allclose(out3, ref_f32(x1), atol=2e-4, rtol=2e-4)

    print("KERNEL_OK")
</pallas_src>

<mosaic_0001>
module attributes {stable_mosaic.version = 11 : i64} {
  func.func @linear_kernel(%arg0: i32, %arg1: memref<8x784xbf16, #tpu.memory_space<vmem>>, %arg2: memref<784x10xbf16, #tpu.memory_space<vmem>>, %arg3: memref<1x10xf32, #tpu.memory_space<vmem>>, %arg4: memref<8x10xf32, #tpu.memory_space<vmem>>) attributes {dimension_semantics = [#tpu.dimension_semantics<parallel>], iteration_bounds = array<i64: 1>, scalar_prefetch = 0 : i64, scratch_operands = 0 : i64, tpu.core_type = #tpu.core_type<tc>, window_params = [{transform_indices = @transform_0, window_bounds = array<i64: 8, 784>}, {pipeline_mode = #tpu.pipeline_mode<synchronous>, transform_indices = @transform_1, window_bounds = array<i64: 784, 10>}, {pipeline_mode = #tpu.pipeline_mode<synchronous>, transform_indices = @transform_2, window_bounds = array<i64: 1, 10>}, {transform_indices = @transform_3, window_bounds = array<i64: 8, 10>}]} {
    %c0 = arith.constant 0 : index
    %c0_0 = arith.constant 0 : index
    %0 = vector.load %arg1[%c0, %c0_0] : memref<8x784xbf16, #tpu.memory_space<vmem>>, vector<8x784xbf16>
    %c0_1 = arith.constant 0 : index
    %c0_2 = arith.constant 0 : index
    %1 = vector.load %arg2[%c0_1, %c0_2] : memref<784x10xbf16, #tpu.memory_space<vmem>>, vector<784x10xbf16>
    %cst = arith.constant dense<0.000000e+00> : vector<8x10xf32>
    %2 = tpu.matmul %0, %1, %cst {dimension_numbers = #tpu.dot_dimension_numbers<[1], [0], [0], [1], [0, 0, 1, 1], [], []>} : vector<8x784xbf16>, vector<784x10xbf16>, vector<8x10xf32> -> vector<8x10xf32>
    %c0_3 = arith.constant 0 : index
    %c0_4 = arith.constant 0 : index
    %3 = vector.load %arg3[%c0_3, %c0_4] : memref<1x10xf32, #tpu.memory_space<vmem>>, vector<1x10xf32>
    %4 = vector.broadcast %3 : vector<1x10xf32> to vector<8x10xf32>
    %5 = arith.addf %2, %4 : vector<8x10xf32>
    %c0_5 = arith.constant 0 : index
    %c0_6 = arith.constant 0 : index
    %6 = vector.load %arg4[%c0_5, %c0_6] : memref<8x10xf32, #tpu.memory_space<vmem>>, vector<8x10xf32>
    tpu.vector_store %arg4[%c0_5, %c0_6], %5 {strides = array<i32>} : memref<8x10xf32, #tpu.memory_space<vmem>>, vector<8x10xf32>,
    return
  }
  func.func @transform_0(%arg0: i32) -> (i32, i32) {
    %c0_i32 = arith.constant 0 : i32
    %c0_i32_0 = arith.constant 0 : i32
    return %arg0, %c0_i32 : i32, i32
  }
  func.func @transform_1(%arg0: i32) -> (i32, i32) {
    %c0_i32 = arith.constant 0 : i32
    %c0_i32_0 = arith.constant 0 : i32
    %c0_i32_1 = arith.constant 0 : i32
    return %c0_i32, %c0_i32_0 : i32, i32
  }
  func.func @transform_2(%arg0: i32) -> (i32, i32) {
    %c0_i32 = arith.constant 0 : i32
    %c0_i32_0 = arith.constant 0 : i32
    %c0_i32_1 = arith.constant 0 : i32
    return %c0_i32, %c0_i32_0 : i32, i32
  }
  func.func @transform_3(%arg0: i32) -> (i32, i32) {
    %c0_i32 = arith.constant 0 : i32
    %c0_i32_0 = arith.constant 0 : i32
    return %arg0, %c0_i32 : i32, i32
  }
}

</mosaic_0001>

<bundles_post_ra>
// kernel: tpu_custom_call.1
= control target key start
LH: loop header
LB: loop body
LE: loop exit
PB: predicated region body
PF: predicated region fallthrough
CT: control target
= control target key end

     0   :  { %v838_v43 = vmov 0.0   ;;  %vm839_vm0 = vmmov 0   ;;  %s1035_s0 = inlined_call_operand.vmem [shape: bf16[8,784], index: 0, kind: input, shape index: {}]   ;;  %s1036_s1 = inlined_call_operand.vmem [shape: bf16[784,10], index: 1, kind: input, shape index: {}]   ;;  %s1037_s2 = inlined_call_operand.vmem [shape: f32[1,10], index: 2, kind: input, shape index: {}]   ;;  %s1038_s3 = inlined_call_operand.hbm [shape: f32[8,10], index: 3, kind: output, shape index: {}]  }
   0x1   :  { %v758_v0 = vld [vmem:[%s1036_s1 + $0x40] sm:$0xff]   ;;  %v762_v4 = vld [vmem:[%s1036_s1 + $0x48] sm:$0xff]   ;;  %v766_v8 = vld [vmem:[%s1036_s1 + $0x50] sm:$0xff]  }
   0x2   :  { %v759_v1 = vld [vmem:[%s1036_s1] sm:$0xff]   ;;  %681 = vmatprep.subr.bf16.mxu0 %v758_v0  ;;  %v763_v5 = vld [vmem:[%s1036_s1 + $0x8] sm:$0xff]   ;;  %v767_v9 = vld [vmem:[%s1036_s1 + $0x10] sm:$0xff]  }
   0x3   :  { %v760_v2 = vld [vmem:[%s1036_s1 + $0xc0] sm:$0xff]   ;;  %682 = vmatpush3.bf16.msra.mxu0 %v759_v1  ;;  %v764_v6 = vld [vmem:[%s1036_s1 + $0xc8] sm:$0xff]   ;;  %v768_v10 = vld [vmem:[%s1036_s1 + $0xd0] sm:$0xff]  }
   0x4   :  { %v761_v3 = vld [vmem:[%s1036_s1 + $0x80] sm:$0xff]   ;;  %703 = vmatprep.subr.bf16.mxu1 %v760_v2  ;;  %683 = vmatprep.subr.bf16.mxu0 %v762_v4  ;;  %v765_v7 = vld [vmem:[%s1036_s1 + $0x88] sm:$0xff]   ;;  %v769_v11 = vld [vmem:[%s1036_s1 + $0x90] sm:$0xff]  }
   0x5   :  { %704 = vmatpush3.bf16.msra.mxu1 %v761_v3  ;;  %v770_v12 = vld [vmem:[%s1036_s1 + $0x58] sm:$0xff]   ;;  %v774_v16 = vld [vmem:[%s1036_s1 + $0x60] sm:$0xff]   ;;  %v778_v20 = vld [vmem:[%s1036_s1 + $0x68] sm:$0xff]  }
   0x6   :  { %705 = vmatprep.subr.bf16.mxu1 %v764_v6  ;;  %v771_v13 = vld [vmem:[%s1036_s1 + $0x18] sm:$0xff]   ;;  %v775_v17 = vld [vmem:[%s1036_s1 + $0x20] sm:$0xff]   ;;  %v779_v21 = vld [vmem:[%s1036_s1 + $0x28] sm:$0xff]  }
   0x7   :  { %684 = vmatpush3.bf16.msra.mxu0 %v763_v5  ;;  %v772_v14 = vld [vmem:[%s1036_s1 + $0xd8] sm:$0xff]   ;;  %v776_v18 = vld [vmem:[%s1036_s1 + $0xe0] sm:$0xff]   ;;  %v780_v22 = vld [vmem:[%s1036_s1 + $0xe8] sm:$0xff]  }
   0x8   :  { %685 = vmatprep.subr.bf16.mxu0 %v766_v8  ;;  %v773_v15 = vld [vmem:[%s1036_s1 + $0x98] sm:$0xff]   ;;  %v777_v19 = vld [vmem:[%s1036_s1 + $0xa0] sm:$0xff]   ;;  %v781_v23 = vld [vmem:[%s1036_s1 + $0xa8] sm:$0xff]  }
   0x9   :  { %706 = vmatpush3.bf16.msra.mxu1 %v765_v7  ;;  %v782_v24 = vld [vmem:[%s1036_s1 + $0x70] sm:$0xff]   ;;  %v786_v28 = vld [vmem:[%s1036_s1 + $0x78] sm:$0xff]   ;;  %v16_v31 = vld [vmem:[%s1035_s0] sm:$0xff] }
   0xa   :  { %707 = vmatprep.subr.bf16.mxu1 %v768_v10  ;;  %v783_v25 = vld [vmem:[%s1036_s1 + $0x30] sm:$0xff]   ;;  %v787_v29 = vld [vmem:[%s1036_s1 + $0x38] sm:$0xff]   ;;  %v624_v32 = vcombine.low %v16_v31, %v16_v31  ;;  %v625_v33 = vcombine.high %v16_v31, %v16_v31  ;;  %v792_v35 = vld [vmem:[%s1036_s1 + $0x140] sm:$0xff]  }
   0xb   :  { %686 = vmatpush3.bf16.msra.mxu0 %v767_v9  ;;  %v784_v26 = vld [vmem:[%s1036_s1 + $0xf0] sm:$0xff]   ;;  %v788_v30 = vld [vmem:[%s1036_s1 + $0xf8] sm:$0xff]   ;;  %v17_v36 = vld [vmem:[%s1035_s0 + $0x8] sm:$0xff] }
   0xc   :  { %687 = vmatprep.subr.bf16.mxu0 %v770_v12  ;;  %v785_v27 = vld [vmem:[%s1036_s1 + $0xb0] sm:$0xff]   ;;  %v791_v34 = vld [vmem:[%s1036_s1 + $0xb8] sm:$0xff]   ;;  %479 = vmatprep.mubr.bf16.mxu0 %v625_v33  ;;  %v626_v37 = vcombine.low %v17_v36, %v17_v36  ;;  %v627_v38 = vcombine.high %v17_v36, %v17_v36  ;;  %v795_v39 = vld [vmem:[%s1036_s1 + $0x100] sm:$0xff]  }
   0xd   :  { %708 = vmatpush3.bf16.msra.mxu1 %v769_v11  ;;  %v796_v40 = vld [vmem:[%s1036_s1 + $0x148] sm:$0xff]   ;;  %v798_v42 = vld [vmem:[%s1036_s1 + $0x150] sm:$0xff]   ;;  %v800_v45 = vld [vmem:[%s1036_s1 + $0x158] sm:$0xff]  }
   0xe   :  { %709 = vmatprep.subr.bf16.mxu1 %v772_v14  ;;  %519 = vmatprep.mubr.bf16.mxu1 %v627_v38  ;;  %v797_v41 = vld [vmem:[%s1036_s1 + $0x108] sm:$0xff]   ;;  %v799_v44 = vld [vmem:[%s1036_s1 + $0x110] sm:$0xff]   ;;  %v801_v46 = vld [vmem:[%s1036_s1 + $0x118] sm:$0xff]  }
   0xf   :  { %688 = vmatpush3.bf16.msra.mxu0 %v771_v13  ;;  %v802_v47 = vld [vmem:[%s1036_s1 + $0x160] sm:$0xff]   ;;  %v804_v49 = vld [vmem:[%s1036_s1 + $0x168] sm:$0xff]   ;;  %v18_v51 = vld [vmem:[%s1035_s0 + $0x10] sm:$0xff] }
  0x10   :  { %689 = vmatprep.subr.bf16.mxu0 %v774_v16  ;;  %v803_v48 = vld [vmem:[%s1036_s1 + $0x120] sm:$0xff]   ;;  %v629_v52 = vcombine.high %v18_v51, %v18_v51  ;;  %v813_v53 = vld [vmem:[%s1035_s0 + $0x18] ss:$0 sps:$4 sm:$0xff]  }
  0x11   :  { %710 = vmatpush3.bf16.msra.mxu1 %v773_v15  ;;  %v810_v50 = vld [vmem:[%s1036_s1 + $0x180] sm:$0xff]  }
  0x12   :  { %711 = vmatprep.subr.bf16.mxu1 %v776_v18 }
  0x13   :  { %690 = vmatpush3.bf16.msra.mxu0 %v775_v17 }
  0x14   :  { %691 = vmatprep.subr.bf16.mxu0 %v778_v20 }
  0x15   :  { %712 = vmatpush3.bf16.msra.mxu1 %v777_v19 }
  0x16   :  { %713 = vmatprep.subr.bf16.mxu1 %v780_v22 }
  0x17   :  { %692 = vmatpush3.bf16.msra.mxu0 %v779_v21 }
  0x18   :  { %693 = vmatprep.subr.bf16.mxu0 %v782_v24 }
  0x19   :  { %714 = vmatpush3.bf16.msra.mxu1 %v781_v23 }
  0x1a   :  { %715 = vmatprep.subr.bf16.mxu1 %v784_v26 }
  0x1b   :  { %694 = vmatpush3.bf16.msra.mxu0 %v783_v25 }
  0x1c   :  { %695 = vmatprep.subr.bf16.mxu0 %v786_v28 }
  0x1d   :  { %716 = vmatpush3.bf16.msra.mxu1 %v785_v27 }
  0x1e   :  { %717 = vmatprep.subr.bf16.mxu1 %v788_v30 }
  0x1f   :  { %696 = vmatpush3.bf16.msra.mxu0 %v787_v29 }
  0x20   :  { %725 = vmatprep.subr.bf16.mxu0 %v792_v35 }
  0x21   :  { %718 = vmatpush3.bf16.msra.mxu1 %v791_v34 }
  0x22   :  { %480 = vmatmul.mubr.bf16.vlgmr.msra.gmra.mrb[0].mxu0 %v624_v32  ;;  %749 = vmatprep.subr.bf16.mxu1 %v838_v43 }
  0x23   :  { %726 = vmatpush3.bf16.msra.mxu0 %v795_v39 }
  0x24   :  { %520 = vmatmul.mubr.bf16.vlgmr.msra.gmra.mrb[0].mxu1 %v626_v37  ;;  %727 = vmatprep.subr.bf16.mxu0 %v796_v40 }
  0x25   :  { %751 = vmatprep.mubr.msk.bf16.mxu1 %vm839_vm0, %v838_v43 }
  0x27   :  { %728 = vmatpush3.bf16.msra.mxu0 %v797_v41 }
  0x28   :  { %729 = vmatprep.subr.bf16.mxu0 %v798_v42 }
  0x2b   :  { %730 = vmatpush3.bf16.msra.mxu0 %v799_v44 }
  0x2c   :  { %731 = vmatprep.subr.bf16.mxu0 %v800_v45 }
  0x2f   :  { %732 = vmatpush3.bf16.msra.mxu0 %v801_v46 }
  0x30   :  { %733 = vmatprep.subr.bf16.mxu0 %v802_v47 }
  0x31   :  { %8 = vsyncpa [#allocation3], 0  ;;  %750 = vmatpush3.bf16.msra.mxu1 %v810_v50  ;;  %vm443_vm1 = vcmask 130048   ;;  %v805_v54 = vld [vmem:[%s1036_s1 + $0x128] sm:$0xff]   ;;  %559 = vmatprep.mubr.bf16.mxu0 %v629_v52  ;;  %v806_v55 = vld [vmem:[%s1036_s1 + $0x170] sm:$0xff]   ;;  %v628_v59 = vcombine.low %v18_v51, %v18_v51  ;;  %vm607_vm2 = vcmask 80896  }
  0x32   :  { %v807_v56 = vld [vmem:[%s1036_s1 + $0x130] sm:$0xff]   ;;  %v808_v57 = vld [vmem:[%s1036_s1 + $0x178] sm:$0xff]   ;;  %v623_v61 = vld [vmem:[%s1037_s2] ss:$0 sm:$0xff] }
  0x33   :  { %734 = vmatpush3.bf16.msra.mxu0 %v803_v48  ;;  %v809_v58 = vld [vmem:[%s1036_s1 + $0x138] sm:$0xff]   ;;  %s840_s1 = smov [#allocation2]  }
  0x34   :  { %735 = vmatprep.subr.bf16.mxu0 %v804_v49  ;;  %752 = vmatmul.mubr.msk.bf16.vlgmr.msra.gmra.mrb[4].mxu1 %vm443_vm1, %v813_v53  ;;  %s615_s2 = sshll.u32 %s840_s1, 4  ;;  %s616_s2 = int_to_ptr.vmem [resolvable:$true] %s615_s2 }
  0x35   :  { %s814_s11 = scalar_lea.vmem %s616_s2, 128  ;;  %p819_p1 = scmp.lt.s32.totalorder %s616_s2, %s616_s2 }
  0x36   :  { %p815_p0 = scmp.ne.s32.totalorder %s616_s2, %s814_s11  ;;  %p820_p2 = scmp.lt.s32.totalorder %s814_s11, %s814_s11 }
  0x37   :  { %736 = vmatpush3.bf16.msra.mxu0 %v805_v54 }
  0x38   :  { %737 = vmatprep.subr.bf16.mxu0 %v806_v55  ;;  %p821_p3 = por %p820_p2, %p819_p1 }
  0x3a   :  { %p822_p4 = pnand %p821_p3, %p815_p0 }
  0x3b   :  { %738 = vmatpush3.bf16.msra.mxu0 %v807_v56 }
  0x3c   :  { %739 = vmatprep.subr.bf16.mxu0 %v808_v57 }
  0x3f   :  { %740 = vmatpush3.bf16.msra.mxu0 %v809_v58 }
  0x42   :  { %560 = vmatmul.mubr.bf16.vlgmr.msra.gmra.mrb[4].mxu0 %v628_v59 }
  0xf5   :  { %v697_v60 = vpop.f32.mrb[0].mxu0 }
  0xf6   :  { %v698_v62 = vpop.f32.mrb[1].mxu0 }
  0xf7   :  { %v699_v63 = vadd.f32 %v698_v62, %v697_v60  ;;  %v700_v0 = vpop.f32.mrb[2].mxu0  ;;  %v719_v1 = vpop.f32.mrb[0].mxu1 }
  0xf8   :  { %v701_v2 = vpop.f32.mrb[3].mxu0  ;;  %v720_v3 = vpop.f32.mrb[1].mxu1 }
  0xf9   :  { %v482_v4 = vadd.f32 %v699_v63, %v623_v61  ;;  %v721_v5 = vadd.f32 %v720_v3, %v719_v1  ;;  %v722_v6 = vpop.f32.mrb[2].mxu1 }
  0xfa   :  { %v723_v7 = vpop.f32.mrb[3].mxu1 }
  0xfb   :  { %v522_v8 = vadd.f32 %v721_v5, %v482_v4 }
 0x107   :  { %v601_v9 = vpop.f32.mrb[4].mxu1 }
 0x108   :  { %v753_v10 = vpop.f32.mrb[5].mxu1 }
 0x109   :  { %v604_v11 = vpop.f32.mrb[6].mxu1 }
 0x10a   :  { %v754_v12 = vpop.f32.mrb[7].mxu1 }
 0x115   :  { %v741_v13 = vpop.f32.mrb[4].mxu0 }
 0x116   :  { %v742_v14 = vpop.f32.mrb[5].mxu0 }
 0x117   :  { %v743_v15 = vadd.f32 %v742_v14, %v741_v13  ;;  %v744_v16 = vpop.f32.mrb[6].mxu0 }
 0x118   :  { %v745_v17 = vpop.f32.mrb[7].mxu0 }
 0x119   :  { %v562_v18 = vadd.f32 %v743_v15, %v522_v8 }
 0x11b   :  { %v602_v19 = vadd.f32 %v601_v9, %v562_v18 }
 0x11d   :  { %608 = vst.msk [vmem:[#allocation2] sm:$0xff] %vm607_vm2, %v602_v19 }
 0x11e   :  { %825 = shalt.err (!%p822_p4)
}
 0x11f   :  { %s826_s14 = scalar_lea.hbm %s1038_s3, 128 }
 0x120   :  { %p827_p5 = scmp.ne.s32.totalorder %s1038_s3, %s826_s14  ;;  %p830_p6 = scmp.lt.u32.totalorder %s826_s14, %s1038_s3 }
 0x122   :  { %p832_p7 = pnand %p830_p6, %p827_p5 }
 0x124   :  { %835 = shalt.err (!%p832_p7)
}
 0x125   :  { %618 = dma.vmem_to_hbm [thread:$0]  %s616_s2, 128, %s1038_s3, [#allocation3]  }
 0x126   :  { %836 = dma.done.wait [#allocation3], 128  }
 0x127   :  { %837 = vsyncadd [#allocation3], 4294967168 }
 0x128   :  { %622 = vsyncpa [#allocation3], 1 }

</bundles_post_ra>
